<compile_context>
chip_gen: v7x
topology: tpu7x:2x2x1
jax: 0.10.0
libtpu: 0.0.40
codegen_flags: <defaults>
</compile_context>

<pallas_src>
import jax
import jax.numpy as jnp
from jax.experimental import pallas as pl
from jax.experimental.pallas import tpu as pltpu


# Fixed module parameters (DietClassifier.__init__):
#   linear.weight = W.T with W the (5, 3) matrix below, so logits = x @ W.
#   linear.bias   = 0   (dropped: softmax over dim=0 is shift-invariant per class).
_W = (
    (0.3, -0.8, 1.2),
    (-0.5, 1.5, -0.2),
    (1.1, 0.2, 0.4),
    (0.7, 1.3, -0.5),
    (0.6, -0.4, 0.8),
)
_NUM_FEATURES = 5
_NUM_CLASSES = 3
_LANE = 128
_NEG_BIG = -1e30          # finite "minus infinity" for accumulator init (NaN-proof)

# Largest single-tile size (in 128-column groups): 1024 groups = 131072 batch
# elements.  Worst-case VMEM (f32 in + f32 out, double buffered) ~ 8 MiB,
# safely under the default scoped-VMEM limit on v5e (16 MiB) / v6e / v7x.
_FUSED_GROUP_CAP = 1024
_TILE_GROUPS = 1024


def _round_up(v, m):
    return ((v + m - 1) // m) * m


def _logit_slabs(x_ref):
    """x_ref block: (5, G, 128) -> list of 3 (G, 128) f32 logit slabs.

    15 scalar*slab FMAs on fully dense vregs (all 8 sublanes used for G >= 8).
    The cast to f32 happens right after the load so bf16/f16 inputs work on
    every generation (v5e VPU has no bf16 math).
    """
    feats = [x_ref[f].astype(jnp.float32) for f in range(_NUM_FEATURES)]
    slabs = []
    for c in range(_NUM_CLASSES):
        acc = feats[0] * _W[0][c]
        for f in range(1, _NUM_FEATURES):
            acc = acc + feats[f] * _W[f][c]
        slabs.append(acc)
    return slabs


def _reduce2d(x, op):
    """Full reduction of a (G, 128) slab to (1, 1): sublane dir first, lanes second."""
    return op(op(x, axis=0, keepdims=True), axis=1, keepdims=True)


def _col_index(start, shape):
    """Global batch-column index of every element of a (G, 128) slab."""
    return (start
            + jax.lax.broadcasted_iota(jnp.int32, shape, 0) * _LANE
            + jax.lax.broadcasted_iota(jnp.int32, shape, 1))


# ----------------------------------------------------------------------------
# Fused path: the whole (padded) batch fits in one lane-dense VMEM tile.
# ----------------------------------------------------------------------------
def _fused_kernel(n_ref, x_ref, o_ref):
    n_valid = n_ref[0]
    slabs = _logit_slabs(x_ref)                    # 3 x (G, 128) f32
    g = slabs[0].shape[0]
    valid = _col_index(0, (g, _LANE)) < n_valid
    for c in range(_NUM_CLASSES):
        lg = jnp.where(valid, slabs[c], -jnp.inf)  # pad columns excluded
        m = _reduce2d(lg, jnp.max)                 # (1, 1)
        e = jnp.exp(lg - m)                        # pads -> exp(-inf) = 0
        s = _reduce2d(e, jnp.sum)                  # (1, 1)
        o_ref[c] = (e * (1.0 / s)).astype(o_ref.dtype)


# ----------------------------------------------------------------------------
# Multi-tile path, pass 1: online per-class max / sum(exp) over batch tiles,
# split into two independent accumulator columns (one per TensorCore on v7x).
# ----------------------------------------------------------------------------
def _stats_kernel(n_ref, x_ref, m_ref, s_ref):
    core = pl.program_id(0)                 # "parallel" axis (2-way split)
    i = pl.program_id(1)                    # "arbitrary" reduction axis
    half = pl.num_programs(1)

    @pl.when(i == 0)
    def _init():
        m_ref[...] = jnp.full(m_ref.shape, _NEG_BIG, dtype=m_ref.dtype)
        s_ref[...] = jnp.zeros(s_ref.shape, dtype=s_ref.dtype)

    slabs = _logit_slabs(x_ref)             # 3 x (G_TILE, 128) f32
    g = slabs[0].shape[0]
    tile_cols = g * _LANE
    start = (core * half + i) * tile_cols
    n_valid = n_ref[0]

    m_prev = m_ref[...]                     # (3, 1), read once
    s_prev = s_ref[...]

    def _online_update(sl):
        bmax = jnp.concatenate([_reduce2d(t, jnp.max) for t in sl], axis=0)     # (3, 1)
        m_new = jnp.maximum(m_prev, bmax)
        psum = jnp.concatenate(
            [_reduce2d(jnp.exp(sl[c] - m_new[c:c + 1, :]), jnp.sum)
             for c in range(_NUM_CLASSES)], axis=0)                             # (3, 1)
        s_new = s_prev * jnp.exp(m_prev - m_new) + psum
        return m_new, s_new

    # Hot path: interior tiles have no padded columns -> no masking ops.
    m_new, s_new = _online_update(slabs)
    m_ref[...] = m_new
    s_ref[...] = s_new

    # Only tiles touching/exceeding the valid-column boundary redo the update
    # with padded columns masked to -inf (at most one boundary tile plus the
    # all-padding tail tiles).  Recomputed from (m_prev, s_prev), so the
    # discarded unmasked write above never leaks into the state.
    @pl.when(start + tile_cols > n_valid)
    def _masked():
        valid = _col_index(start, (g, _LANE)) < n_valid
        masked = [jnp.where(valid, t, -jnp.inf) for t in slabs]
        m2, s2 = _online_update(masked)
        m_ref[...] = m2
        s_ref[...] = s2


# ----------------------------------------------------------------------------
# Multi-tile path, pass 2: softmax^T = exp(logits - m) * inv_s, lane-dense.
# m and inv_s arrive as SMEM scalars (no per-step divide / broadcast).
# ----------------------------------------------------------------------------
def _normalize_kernel(m_ref, inv_ref, x_ref, o_ref):
    slabs = _logit_slabs(x_ref)
    for c in range(_NUM_CLASSES):
        o_ref[c] = (jnp.exp(slabs[c] - m_ref[c]) * inv_ref[c]).astype(o_ref.dtype)


# ----------------------------------------------------------------------------
# Wrapper
# ----------------------------------------------------------------------------
def diet_classifier(x, *, max_fused_groups=_FUSED_GROUP_CAP, tile_groups=_TILE_GROUPS):
    """x: (N, 5) float -> softmax(x @ W, axis=0) as (N, 3) float32."""
    n, f = x.shape
    assert f == _NUM_FEATURES
    out_dtype = jnp.float32
    groups = pl.cdiv(n, _LANE)                       # pad batch only to 128
    n_arr = jnp.array([n], dtype=jnp.int32)          # SMEM scalar, not baked in

    if groups <= max_fused_groups:
        # ---- Fused single-tile path (one launch, one read of x). ----
        padded_groups = groups
        cols = padded_groups * _LANE
        # Keep x's own dtype (no wrapper upcast); cast to f32 inside the kernel.
        xt3 = jnp.pad(x.T, ((0, 0), (0, cols - n))).reshape(
            _NUM_FEATURES, padded_groups, _LANE)

        ot3 = pl.pallas_call(
            _fused_kernel,
            out_shape=jax.ShapeDtypeStruct((_NUM_CLASSES, padded_groups, _LANE),
                                           out_dtype),
            grid=(1,),
            in_specs=[pl.BlockSpec(memory_space=pltpu.MemorySpace.SMEM),
                      pl.BlockSpec((_NUM_FEATURES, padded_groups, _LANE),
                                   lambda i: (0, 0, 0))],
            out_specs=pl.BlockSpec((_NUM_CLASSES, padded_groups, _LANE),
                                   lambda i: (0, 0, 0)),
        )(n_arr, xt3)
    else:
        # ---- Two-pass path for batches that don't fit one VMEM tile. ----
        # Adaptive tile size keeps padding waste small (<~2%) while keeping
        # per-step DMA well above the ~0.35 us grid-step overhead.
        half = max(1, pl.cdiv(groups, 2 * tile_groups))      # steps per column
        g_tile = _round_up(pl.cdiv(groups, 2 * half), 8)     # groups per tile
        padded_groups = 2 * half * g_tile
        num_tiles = 2 * half
        cols = padded_groups * _LANE
        xt3 = jnp.pad(x.T, ((0, 0), (0, cols - n))).reshape(
            _NUM_FEATURES, padded_groups, _LANE)

        # Pass 1: two independent online-softmax accumulator columns.
        m_parts, s_parts = pl.pallas_call(
            _stats_kernel,
            out_shape=(jax.ShapeDtypeStruct((2, _NUM_CLASSES, 1), jnp.float32),
                       jax.ShapeDtypeStruct((2, _NUM_CLASSES, 1), jnp.float32)),
            grid=(2, half),
            in_specs=[pl.BlockSpec(memory_space=pltpu.MemorySpace.SMEM),
                      pl.BlockSpec((_NUM_FEATURES, g_tile, _LANE),
                                   lambda c, i: (0, c * half + i, 0))],
            out_specs=[pl.BlockSpec((None, _NUM_CLASSES, 1), lambda c, i: (c, 0, 0)),
                       pl.BlockSpec((None, _NUM_CLASSES, 1), lambda c, i: (c, 0, 0))],
            compiler_params=pltpu.CompilerParams(
                dimension_semantics=("parallel", "arbitrary")),
        )(n_arr, xt3)

        # Merge the two partial states + one exact divide (tiny XLA ops).
        m2 = m_parts[:, :, 0]                                 # (2, 3)
        s2 = s_parts[:, :, 0]
        m_full = jnp.max(m2, axis=0)                          # (3,)
        s_full = jnp.sum(s2 * jnp.exp(m2 - m_full), axis=0)   # (3,)
        inv_s = 1.0 / s_full                                  # (3,)

        # Pass 2: normalize, lane-dense output, tiles independent.
        ot3 = pl.pallas_call(
            _normalize_kernel,
            out_shape=jax.ShapeDtypeStruct((_NUM_CLASSES, padded_groups, _LANE),
                                           out_dtype),
            grid=(num_tiles,),
            in_specs=[pl.BlockSpec(memory_space=pltpu.MemorySpace.SMEM),
                      pl.BlockSpec(memory_space=pltpu.MemorySpace.SMEM),
                      pl.BlockSpec((_NUM_FEATURES, g_tile, _LANE),
                                   lambda i: (0, i, 0))],
            out_specs=pl.BlockSpec((_NUM_CLASSES, g_tile, _LANE),
                                   lambda i: (0, i, 0)),
            compiler_params=pltpu.CompilerParams(
                dimension_semantics=("parallel",)),
        )(m_full, inv_s, xt3)

    # Back to the module's (N, 3) layout (interface-level plumbing; pad columns
    # beyond n hold garbage and are sliced off here).
    return ot3.reshape(_NUM_CLASSES, -1)[:, :n].T.astype(out_dtype)


if __name__ == "__main__":
    w = jnp.array(_W, dtype=jnp.float32)              # (5, 3) == weight.T
    key = jax.random.PRNGKey(0)

    # Primary check: module-sized demo batch (N=8, 5 features) -> fused path.
    x = jax.random.normal(key, (8, _NUM_FEATURES), dtype=jnp.float32)
    out = jax.block_until_ready(diet_classifier(x))
    ref = jax.nn.softmax(x @ w, axis=0)
    assert out.shape == (8, _NUM_CLASSES)
    assert jnp.allclose(out, ref, atol=1e-5, rtol=1e-5)

    # Fused path with multiple 128-groups and a padded tail (N=300 -> 3 groups).
    x2 = jax.random.normal(key, (300, _NUM_FEATURES), dtype=jnp.float32)
    out2 = jax.block_until_ready(diet_classifier(x2))
    ref2 = jax.nn.softmax(x2 @ w, axis=0)
    assert out2.shape == (300, _NUM_CLASSES)
    assert jnp.allclose(out2, ref2, atol=1e-5, rtol=1e-5)

    # Force the multi-tile two-pass path with tiny tiles so the 2-way split
    # pass 1, boundary masking, all-padding tail tiles and the wrapper merge
    # are all exercised cheaply.
    x3 = jax.random.normal(key, (3000, _NUM_FEATURES), dtype=jnp.float32)
    out3 = jax.block_until_ready(
        diet_classifier(x3, max_fused_groups=1, tile_groups=8))
    ref3 = jax.nn.softmax(x3 @ w, axis=0)
    assert jnp.allclose(out3, ref3, atol=1e-5, rtol=1e-5)

    # Same forced path where one whole accumulator column sees only padding
    # (exercises the finite -1e30 init / NaN-free merge).
    out4 = jax.block_until_ready(
        diet_classifier(x2, max_fused_groups=1, tile_groups=8))
    assert jnp.allclose(out4, ref2, atol=1e-5, rtol=1e-5)

    print("KERNEL_OK")
</pallas_src>

<mosaic_0001>
module attributes {stable_mosaic.version = 11 : i64} {
  func.func @_fused_kernel(%arg0: i32, %arg1: memref<1xi32, #tpu.memory_space<smem>>, %arg2: memref<5x1x128xf32, #tpu.memory_space<vmem>>, %arg3: memref<3x1x128xf32, #tpu.memory_space<vmem>>) attributes {dimension_semantics = [#tpu.dimension_semantics<arbitrary>], iteration_bounds = array<i64: 1>, scalar_prefetch = 0 : i64, scratch_operands = 0 : i64, tpu.core_type = #tpu.core_type<tc>, window_params = [{transform_indices = @transform_0, window_bounds = array<i64: 1>}, {pipeline_mode = #tpu.pipeline_mode<synchronous>, transform_indices = @transform_1, window_bounds = array<i64: 5, 1, 128>}, {pipeline_mode = #tpu.pipeline_mode<synchronous>, transform_indices = @transform_2, window_bounds = array<i64: 3, 1, 128>}]} {
    %c0 = arith.constant 0 : index
    %0 = memref.load %arg1[%c0] : memref<1xi32, #tpu.memory_space<smem>>
    %c0_0 = arith.constant 0 : index
    %c0_1 = arith.constant 0 : index
    %c0_2 = arith.constant 0 : index
    %1 = vector.load %arg2[%c0_0, %c0_1, %c0_2] : memref<5x1x128xf32, #tpu.memory_space<vmem>>, vector<1x1x128xf32>
    %2 = vector.shape_cast %1 : vector<1x1x128xf32> to vector<1x128xf32>
    %c1 = arith.constant 1 : index
    %c0_3 = arith.constant 0 : index
    %c0_4 = arith.constant 0 : index
    %3 = vector.load %arg2[%c1, %c0_3, %c0_4] : memref<5x1x128xf32, #tpu.memory_space<vmem>>, vector<1x1x128xf32>
    %4 = vector.shape_cast %3 : vector<1x1x128xf32> to vector<1x128xf32>
    %c2 = arith.constant 2 : index
    %c0_5 = arith.constant 0 : index
    %c0_6 = arith.constant 0 : index
    %5 = vector.load %arg2[%c2, %c0_5, %c0_6] : memref<5x1x128xf32, #tpu.memory_space<vmem>>, vector<1x1x128xf32>
    %6 = vector.shape_cast %5 : vector<1x1x128xf32> to vector<1x128xf32>
    %c3 = arith.constant 3 : index
    %c0_7 = arith.constant 0 : index
    %c0_8 = arith.constant 0 : index
    %7 = vector.load %arg2[%c3, %c0_7, %c0_8] : memref<5x1x128xf32, #tpu.memory_space<vmem>>, vector<1x1x128xf32>
    %8 = vector.shape_cast %7 : vector<1x1x128xf32> to vector<1x128xf32>
    %c4 = arith.constant 4 : index
    %c0_9 = arith.constant 0 : index
    %c0_10 = arith.constant 0 : index
    %9 = vector.load %arg2[%c4, %c0_9, %c0_10] : memref<5x1x128xf32, #tpu.memory_space<vmem>>, vector<1x1x128xf32>
    %10 = vector.shape_cast %9 : vector<1x1x128xf32> to vector<1x128xf32>
    %cst = arith.constant 3.000000e-01 : f32
    %11 = vector.broadcast %cst : f32 to vector<1x128xf32>
    %12 = arith.mulf %2, %11 : vector<1x128xf32>
    %cst_11 = arith.constant -5.000000e-01 : f32
    %13 = vector.broadcast %cst_11 : f32 to vector<1x128xf32>
    %14 = arith.mulf %4, %13 : vector<1x128xf32>
    %15 = arith.addf %12, %14 : vector<1x128xf32>
    %cst_12 = arith.constant 1.100000e+00 : f32
    %16 = vector.broadcast %cst_12 : f32 to vector<1x128xf32>
    %17 = arith.mulf %6, %16 : vector<1x128xf32>
    %18 = arith.addf %15, %17 : vector<1x128xf32>
    %cst_13 = arith.constant 0.699999988 : f32
    %19 = vector.broadcast %cst_13 : f32 to vector<1x128xf32>
    %20 = arith.mulf %8, %19 : vector<1x128xf32>
    %21 = arith.addf %18, %20 : vector<1x128xf32>
    %cst_14 = arith.constant 6.000000e-01 : f32
    %22 = vector.broadcast %cst_14 : f32 to vector<1x128xf32>
    %23 = arith.mulf %10, %22 : vector<1x128xf32>
    %24 = arith.addf %21, %23 : vector<1x128xf32>
    %cst_15 = arith.constant -8.000000e-01 : f32
    %25 = vector.broadcast %cst_15 : f32 to vector<1x128xf32>
    %26 = arith.mulf %2, %25 : vector<1x128xf32>
    %cst_16 = arith.constant 1.500000e+00 : f32
    %27 = vector.broadcast %cst_16 : f32 to vector<1x128xf32>
    %28 = arith.mulf %4, %27 : vector<1x128xf32>
    %29 = arith.addf %26, %28 : vector<1x128xf32>
    %cst_17 = arith.constant 2.000000e-01 : f32
    %30 = vector.broadcast %cst_17 : f32 to vector<1x128xf32>
    %31 = arith.mulf %6, %30 : vector<1x128xf32>
    %32 = arith.addf %29, %31 : vector<1x128xf32>
    %cst_18 = arith.constant 1.300000e+00 : f32
    %33 = vector.broadcast %cst_18 : f32 to vector<1x128xf32>
    %34 = arith.mulf %8, %33 : vector<1x128xf32>
    %35 = arith.addf %32, %34 : vector<1x128xf32>
    %cst_19 = arith.constant -4.000000e-01 : f32
    %36 = vector.broadcast %cst_19 : f32 to vector<1x128xf32>
    %37 = arith.mulf %10, %36 : vector<1x128xf32>
    %38 = arith.addf %35, %37 : vector<1x128xf32>
    %cst_20 = arith.constant 1.200000e+00 : f32
    %39 = vector.broadcast %cst_20 : f32 to vector<1x128xf32>
    %40 = arith.mulf %2, %39 : vector<1x128xf32>
    %cst_21 = arith.constant -2.000000e-01 : f32
    %41 = vector.broadcast %cst_21 : f32 to vector<1x128xf32>
    %42 = arith.mulf %4, %41 : vector<1x128xf32>
    %43 = arith.addf %40, %42 : vector<1x128xf32>
    %cst_22 = arith.constant 4.000000e-01 : f32
    %44 = vector.broadcast %cst_22 : f32 to vector<1x128xf32>
    %45 = arith.mulf %6, %44 : vector<1x128xf32>
    %46 = arith.addf %43, %45 : vector<1x128xf32>
    %cst_23 = arith.constant -5.000000e-01 : f32
    %47 = vector.broadcast %cst_23 : f32 to vector<1x128xf32>
    %48 = arith.mulf %8, %47 : vector<1x128xf32>
    %49 = arith.addf %46, %48 : vector<1x128xf32>
    %cst_24 = arith.constant 8.000000e-01 : f32
    %50 = vector.broadcast %cst_24 : f32 to vector<1x128xf32>
    %51 = arith.mulf %10, %50 : vector<1x128xf32>
    %52 = arith.addf %49, %51 : vector<1x128xf32>
    %53 = tpu.iota {dimensions = array<i32: 0>} : vector<1x128xi32>
    %c128_i32 = arith.constant 128 : i32
    %54 = vector.broadcast %c128_i32 : i32 to vector<1x128xi32>
    %55 = arith.muli %53, %54 : vector<1x128xi32>
    %c0_i32 = arith.constant 0 : i32
    %56 = vector.broadcast %c0_i32 : i32 to vector<1x128xi32>
    %57 = arith.addi %56, %55 : vector<1x128xi32>
    %58 = tpu.iota {dimensions = array<i32: 1>} : vector<1x128xi32>
    %59 = arith.addi %57, %58 : vector<1x128xi32>
    %60 = vector.broadcast %0 : i32 to vector<1x128xi32>
    %61 = arith.cmpi slt, %59, %60 : vector<1x128xi32>
    %cst_25 = arith.constant 0xFF800000 : f32
    %62 = vector.broadcast %cst_25 : f32 to vector<1x128xf32>
    %63 = arith.select %61, %24, %62 : vector<1x128xi1>, vector<1x128xf32>
    %cst_26 = arith.constant dense<0xFF800000> : vector<128xf32>
    %64 = vector.multi_reduction <maximumf>, %63, %cst_26 [0] : vector<1x128xf32> to vector<128xf32>
    %65 = vector.shape_cast %64 : vector<128xf32> to vector<1x128xf32>
    %cst_27 = arith.constant dense<0xFF800000> : vector<1xf32>
    %66 = vector.multi_reduction <maximumf>, %65, %cst_27 [1] : vector<1x128xf32> to vector<1xf32>
    %67 = vector.shape_cast %66 : vector<1xf32> to vector<1x1xf32>
    %68 = vector.broadcast %67 : vector<1x1xf32> to vector<1x128xf32>
    %69 = arith.subf %63, %68 : vector<1x128xf32>
    %70 = math.exp %69 : vector<1x128xf32>
    %cst_28 = arith.constant dense<0.000000e+00> : vector<128xf32>
    %71 = vector.multi_reduction <add>, %70, %cst_28 [0] : vector<1x128xf32> to vector<128xf32>
    %72 = vector.shape_cast %71 : vector<128xf32> to vector<1x128xf32>
    %cst_29 = arith.constant dense<0.000000e+00> : vector<1xf32>
    %73 = vector.multi_reduction <add>, %72, %cst_29 [1] : vector<1x128xf32> to vector<1xf32>
    %74 = vector.shape_cast %73 : vector<1xf32> to vector<1x1xf32>
    %cst_30 = arith.constant 1.000000e+00 : f32
    %75 = vector.broadcast %cst_30 : f32 to vector<1x1xf32>
    %76 = arith.divf %75, %74 : vector<1x1xf32>
    %77 = vector.broadcast %76 : vector<1x1xf32> to vector<1x128xf32>
    %78 = arith.mulf %70, %77 : vector<1x128xf32>
    %c0_31 = arith.constant 0 : index
    %c0_32 = arith.constant 0 : index
    %c0_33 = arith.constant 0 : index
    %79 = vector.load %arg3[%c0_31, %c0_32, %c0_33] : memref<3x1x128xf32, #tpu.memory_space<vmem>>, vector<1x1x128xf32>
    %80 = vector.shape_cast %79 : vector<1x1x128xf32> to vector<1x128xf32>
    %81 = vector.shape_cast %78 : vector<1x128xf32> to vector<1x1x128xf32>
    tpu.vector_store %arg3[%c0_31, %c0_32, %c0_33], %81 {strides = array<i32>} : memref<3x1x128xf32, #tpu.memory_space<vmem>>, vector<1x1x128xf32>,
    %cst_34 = arith.constant 0xFF800000 : f32
    %82 = vector.broadcast %cst_34 : f32 to vector<1x128xf32>
    %83 = arith.select %61, %38, %82 : vector<1x128xi1>, vector<1x128xf32>
    %cst_35 = arith.constant dense<0xFF800000> : vector<128xf32>
    %84 = vector.multi_reduction <maximumf>, %83, %cst_35 [0] : vector<1x128xf32> to vector<128xf32>
    %85 = vector.shape_cast %84 : vector<128xf32> to vector<1x128xf32>
    %cst_36 = arith.constant dense<0xFF800000> : vector<1xf32>
    %86 = vector.multi_reduction <maximumf>, %85, %cst_36 [1] : vector<1x128xf32> to vector<1xf32>
    %87 = vector.shape_cast %86 : vector<1xf32> to vector<1x1xf32>
    %88 = vector.broadcast %87 : vector<1x1xf32> to vector<1x128xf32>
    %89 = arith.subf %83, %88 : vector<1x128xf32>
    %90 = math.exp %89 : vector<1x128xf32>
    %cst_37 = arith.constant dense<0.000000e+00> : vector<128xf32>
    %91 = vector.multi_reduction <add>, %90, %cst_37 [0] : vector<1x128xf32> to vector<128xf32>
    %92 = vector.shape_cast %91 : vector<128xf32> to vector<1x128xf32>
    %cst_38 = arith.constant dense<0.000000e+00> : vector<1xf32>
    %93 = vector.multi_reduction <add>, %92, %cst_38 [1] : vector<1x128xf32> to vector<1xf32>
    %94 = vector.shape_cast %93 : vector<1xf32> to vector<1x1xf32>
    %cst_39 = arith.constant 1.000000e+00 : f32
    %95 = vector.broadcast %cst_39 : f32 to vector<1x1xf32>
    %96 = arith.divf %95, %94 : vector<1x1xf32>
    %97 = vector.broadcast %96 : vector<1x1xf32> to vector<1x128xf32>
    %98 = arith.mulf %90, %97 : vector<1x128xf32>
    %c1_40 = arith.constant 1 : index
    %c0_41 = arith.constant 0 : index
    %c0_42 = arith.constant 0 : index
    %99 = vector.load %arg3[%c1_40, %c0_41, %c0_42] : memref<3x1x128xf32, #tpu.memory_space<vmem>>, vector<1x1x128xf32>
    %100 = vector.shape_cast %99 : vector<1x1x128xf32> to vector<1x128xf32>
    %101 = vector.shape_cast %98 : vector<1x128xf32> to vector<1x1x128xf32>
    tpu.vector_store %arg3[%c1_40, %c0_41, %c0_42], %101 {strides = array<i32>} : memref<3x1x128xf32, #tpu.memory_space<vmem>>, vector<1x1x128xf32>,
    %cst_43 = arith.constant 0xFF800000 : f32
    %102 = vector.broadcast %cst_43 : f32 to vector<1x128xf32>
    %103 = arith.select %61, %52, %102 : vector<1x128xi1>, vector<1x128xf32>
    %cst_44 = arith.constant dense<0xFF800000> : vector<128xf32>
    %104 = vector.multi_reduction <maximumf>, %103, %cst_44 [0] : vector<1x128xf32> to vector<128xf32>
    %105 = vector.shape_cast %104 : vector<128xf32> to vector<1x128xf32>
    %cst_45 = arith.constant dense<0xFF800000> : vector<1xf32>
    %106 = vector.multi_reduction <maximumf>, %105, %cst_45 [1] : vector<1x128xf32> to vector<1xf32>
    %107 = vector.shape_cast %106 : vector<1xf32> to vector<1x1xf32>
    %108 = vector.broadcast %107 : vector<1x1xf32> to vector<1x128xf32>
    %109 = arith.subf %103, %108 : vector<1x128xf32>
    %110 = math.exp %109 : vector<1x128xf32>
    %cst_46 = arith.constant dense<0.000000e+00> : vector<128xf32>
    %111 = vector.multi_reduction <add>, %110, %cst_46 [0] : vector<1x128xf32> to vector<128xf32>
    %112 = vector.shape_cast %111 : vector<128xf32> to vector<1x128xf32>
    %cst_47 = arith.constant dense<0.000000e+00> : vector<1xf32>
    %113 = vector.multi_reduction <add>, %112, %cst_47 [1] : vector<1x128xf32> to vector<1xf32>
    %114 = vector.shape_cast %113 : vector<1xf32> to vector<1x1xf32>
    %cst_48 = arith.constant 1.000000e+00 : f32
    %115 = vector.broadcast %cst_48 : f32 to vector<1x1xf32>
    %116 = arith.divf %115, %114 : vector<1x1xf32>
    %117 = vector.broadcast %116 : vector<1x1xf32> to vector<1x128xf32>
    %118 = arith.mulf %110, %117 : vector<1x128xf32>
    %c2_49 = arith.constant 2 : index
    %c0_50 = arith.constant 0 : index
    %c0_51 = arith.constant 0 : index
    %119 = vector.load %arg3[%c2_49, %c0_50, %c0_51] : memref<3x1x128xf32, #tpu.memory_space<vmem>>, vector<1x1x128xf32>
    %120 = vector.shape_cast %119 : vector<1x1x128xf32> to vector<1x128xf32>
    %121 = vector.shape_cast %118 : vector<1x128xf32> to vector<1x1x128xf32>
    tpu.vector_store %arg3[%c2_49, %c0_50, %c0_51], %121 {strides = array<i32>} : memref<3x1x128xf32, #tpu.memory_space<vmem>>, vector<1x1x128xf32>,
    return
  }
  func.func @transform_0(%arg0: i32) -> i32 {
    %c0_i32 = arith.constant 0 : i32
    %c0_i32_0 = arith.constant 0 : i32
    return %c0_i32 : i32
  }
  func.func @transform_1(%arg0: i32) -> (i32, i32, i32) {
    %c0_i32 = arith.constant 0 : i32
    %c0_i32_0 = arith.constant 0 : i32
    %c0_i32_1 = arith.constant 0 : i32
    %c0_i32_2 = arith.constant 0 : i32
    return %c0_i32, %c0_i32_0, %c0_i32_1 : i32, i32, i32
  }
  func.func @transform_2(%arg0: i32) -> (i32, i32, i32) {
    %c0_i32 = arith.constant 0 : i32
    %c0_i32_0 = arith.constant 0 : i32
    %c0_i32_1 = arith.constant 0 : i32
    %c0_i32_2 = arith.constant 0 : i32
    return %c0_i32, %c0_i32_0, %c0_i32_1 : i32, i32, i32
  }
}

</mosaic_0001>

<bundles_post_ra>
// kernel: tpu_custom_call.1
= control target key start
LH: loop header
LB: loop body
LE: loop exit
PB: predicated region body
PF: predicated region fallthrough
CT: control target
= control target key end

     0   :  { %8 = vsyncpa [#allocation4], 0  ;;  %s259_s0 = inlined_call_operand.<no memory space> [shape: s32[1], index: 0, kind: input, shape index: {}]   ;;  %s260_s1 = inlined_call_operand.hbm [shape: f32[5,1,128], index: 1, kind: input, shape index: {}]   ;;  %s261_s2 = inlined_call_operand.hbm [shape: f32[3,1,128], index: 2, kind: output, shape index: {}]  }
   0x1   :  { %9 = vsyncpa [#allocation5], 0  ;;  %s201_s9 = smov [#allocation3]   ;;  %s153_s13 = scalar_lea.hbm %s260_s1, 80 }
   0x2   :  { %s17_s10 = sshll.u32 %s201_s9, 4  ;;  %p154_p0 = scmp.ne.s32.totalorder %s260_s1, %s153_s13  ;;  %s18_s10 = int_to_ptr.vmem [resolvable:$true] %s17_s10 }
   0x3   :  { %p157_p1 = scmp.lt.u32.totalorder %s153_s13, %s260_s1 }
   0x5   :  { %p159_p2 = pnand %p157_p1, %p154_p0 }
   0x7   :  { %162 = shalt.err (!%p159_p2)
}
   0x8   :  { %s163_s18 = scalar_lea.vmem %s18_s10, 80  ;;  %s167_s19 = scalar_lea.vmem %s18_s10, 96 }
   0x9   :  { %p164_p3 = scmp.ne.s32.totalorder %s18_s10, %s163_s18  ;;  %p168_p4 = scmp.lt.s32.totalorder %s18_s10, %s18_s10 }
   0xa   :  { %p169_p5 = scmp.lt.s32.totalorder %s167_s19, %s163_s18 }
   0xc   :  { %p170_p6 = por %p169_p5, %p168_p4 }
   0xe   :  { %p171_p7 = pnand %p170_p6, %p164_p3 }
  0x10   :  { %174 = shalt.err (!%p171_p7)
}
  0x11   :  { %s202_s20 = smov 16   ;;  %s203_s21 = smov 1  }
  0x12   :  { %23 = dma.hbm_to_vmem [thread:$0]  %s260_s1, 80, %s18_s10, [#allocation4], %s202_s20, %s202_s20, %s203_s21  }
  0x13   :  { %197 = dma.done.wait [#allocation4], 80  }
  0x14   :  { %198 = vsyncadd [#allocation4], 4294967216  ;;  %v64_v0 = vlaneseq  ;;  %v28_v4 = vld [vmem:[#allocation3] sm:$0x1]  ;;  %v30_v5 = vld [vmem:[#allocation3 + $0x1] sm:$0x1]  ;;  %v70_v25 = vstv %s259_s0 }
  0x15   :  { %v32_v6 = vld [vmem:[#allocation3 + $0x2] sm:$0x1]  ;;  %v34_v7 = vld [vmem:[#allocation3 + $0x3] sm:$0x1]  ;;  %v37_v8 = vmul.f32 0.3, %v28_v4 }
  0x16   :  { %v65_v1 = vshrl.u32 %v64_v0, 7  ;;  %v68_v3 = vand.u32 127, %v64_v0  ;;  %v38_v9 = vmul.f32 -0.5, %v30_v5  ;;  %v40_v10 = vmul.f32 1.1, %v32_v6  ;;  %s204_s0 = smov [#allocation6]  }
  0x17   :  { %v36_v11 = vld [vmem:[#allocation3 + $0x4] sm:$0x1]  ;;  %v55_v13 = vmul.f32 1.2, %v28_v4  ;;  %v56_v14 = vmul.f32 -0.2, %v30_v5 }
  0x18   :  { %v66_v2 = vmul.u32 128, %v65_v1  ;;  %v39_v15 = vadd.f32 %v38_v9, %v37_v8  ;;  %v42_v16 = vmul.f32 0.7, %v34_v7  ;;  %v58_v17 = vmul.f32 0.4, %v32_v6  ;;  %s125_s25 = sshll.u32 %s204_s0, 4  ;;  %s126_s25 = int_to_ptr.vmem [resolvable:$true] %s125_s25 }
  0x19   :  { %v46_v18 = vmul.f32 -0.8, %v28_v4  ;;  %v57_v19 = vadd.f32 %v56_v14, %v55_v13  ;;  %v60_v20 = vmul.f32 -0.5, %v34_v7  ;;  %v47_v21 = vmul.f32 1.5, %v30_v5  ;;  %s175_s26 = scalar_lea.vmem %s126_s25, 48  ;;  %s179_s27 = scalar_lea.vmem %s126_s25, 64 }
  0x1a   :  { %v69_v12 = vadd.s32 %v68_v3, %v66_v2  ;;  %v49_v22 = vmul.f32 0.2, %v32_v6  ;;  %v41_v23 = vadd.f32 %v40_v10, %v39_v15  ;;  %v44_v24 = vmul.f32 0.6, %v36_v11  ;;  %p176_p8 = scmp.ne.s32.totalorder %s126_s25, %s175_s26  ;;  %p180_p9 = scmp.lt.s32.totalorder %s126_s25, %s126_s25 }
  0x1b   :  { %v59_v26 = vadd.f32 %v58_v17, %v57_v19  ;;  %v62_v27 = vmul.f32 0.8, %v36_v11  ;;  %v48_v28 = vadd.f32 %v47_v21, %v46_v18  ;;  %v51_v29 = vmul.f32 1.3, %v34_v7  ;;  %p181_p10 = scmp.lt.s32.totalorder %s179_s27, %s175_s26 }
  0x1c   :  { %v43_v30 = vadd.f32 %v42_v16, %v41_v23  ;;  %vm71_vm0 = vcmp.lt.s32.totalorder %v69_v12, %v70_v25  ;;  %v53_v33 = vmul.f32 -0.4, %v36_v11  ;;  %vm73_vm1 = vcmask 1040384  }
  0x1d   :  { %v61_v31 = vadd.f32 %v60_v20, %v59_v26  ;;  %v50_v32 = vadd.f32 %v49_v22, %v48_v28  ;;  %p182_p11 = por %p181_p10, %p180_p9 }
  0x1e   :  { %v45_v34 = vadd.f32 %v44_v24, %v43_v30 }
  0x1f   :  { %v63_v35 = vadd.f32 %v62_v27, %v61_v31  ;;  %v52_v36 = vadd.f32 %v51_v29, %v50_v32  ;;  %p183_p12 = pnand %p182_p11, %p176_p8 }
  0x20   :  { %v72_v37 = vsel %vm71_vm0, %v45_v34, -inf }
  0x21   :  { %v74_v38 = vsel %vm73_vm1, %v72_v37, -inf  ;;  %v104_v39 = vsel %vm71_vm0, %v63_v35, -inf  ;;  %v54_v40 = vadd.f32 %v53_v33, %v52_v36 }
  0x22   :  { %75 = vmax.xlane.f32.xlu0 %v74_v38  ;;  %v105_v41 = vsel %vm73_vm1, %v104_v39, -inf }
  0x23   :  { %106 = vmax.xlane.f32.xlu1 %v105_v41  ;;  %v88_v42 = vsel %vm71_vm0, %v54_v40, -inf }
  0x24   :  { %v89_v43 = vsel %vm73_vm1, %v88_v42, -inf }
  0x26   :  { %90 = vmax.xlane.f32.xlu0 %v89_v43 }
  0xaf   :  { %v76_v44 = vpop.xlane.xlu0 %75 }
  0xb0   :  { %v77_v45 = vsub.f32 %v72_v37, %v76_v44  ;;  %v107_v46 = vpop.xlane.xlu1 %106 }
  0xb1   :  { %v108_v47 = vsub.f32 %v104_v39, %v107_v46 }
  0xb2   :  { %v78_v48 = vmul.f32 1.442695, %v77_v45 }
  0xb3   :  { %v109_v49 = vmul.f32 1.442695, %v108_v47  ;;  %v91_v50 = vpop.xlane.xlu0 %90 }
  0xb4   :  { %141 = vpow2.f32 %v78_v48  ;;  %v92_v51 = vsub.f32 %v88_v42, %v91_v50 }
  0xb5   :  { %143 = vpow2.f32 %v109_v49 }
  0xb6   :  { %v93_v52 = vmul.f32 1.442695, %v92_v51 }
  0xb8   :  { %145 = vpow2.f32 %v93_v52 }
  0xbe   :  { %v142_v53 = vpop.eup %141 }
  0xbf   :  { %v144_v54 = vpop.eup %143  ;;  %v81_v55 = vsel %vm73_vm1, %v142_v53, 0.0 }
  0xc0   :  { %82 = vadd.xlane.f32.xlu1 %v81_v55  ;;  %v112_v56 = vsel %vm73_vm1, %v144_v54, 0.0 }
  0xc2   :  { %v146_v57 = vpop.eup %145 }
  0xc3   :  { %v96_v58 = vsel %vm73_vm1, %v146_v57, 0.0 }
  0xc4   :  { %113 = vadd.xlane.f32.xlu1 %v112_v56  ;;  %97 = vadd.xlane.f32.xlu0 %v96_v58 }
 0x14d   :  { %v83_v59 = vpop.xlane.xlu1 %82 }
 0x14e   :  { %147 = vrcp.f32 %v83_v59 }
 0x151   :  { %v114_v60 = vpop.xlane.xlu1 %113  ;;  %v98_v61 = vpop.xlane.xlu0 %97 }
 0x152   :  { %149 = vrcp.f32 %v114_v60 }
 0x153   :  { %151 = vrcp.f32 %v98_v61 }
 0x158   :  { %v148_v62 = vpop.eup %147 }
 0x159   :  { %v86_v63 = vmul.f32 %v148_v62, %v142_v53 }
 0x15b   :  { %87 = vst [vmem:[#allocation6] sm:$0x1] %v86_v63 }
 0x15c   :  { %v150_v0 = vpop.eup %149 }
 0x15d   :  { %v152_v1 = vpop.eup %151  ;;  %v117_v2 = vmul.f32 %v150_v0, %v144_v54 }
 0x15e   :  { %v101_v3 = vmul.f32 %v152_v1, %v146_v57 }
 0x15f   :  { %119 = vst [vmem:[#allocation6 + $0x2] sm:$0x1] %v117_v2 }
 0x160   :  { %103 = vst [vmem:[#allocation6 + $0x1] sm:$0x1] %v101_v3 }
 0x161   :  { %186 = shalt.err (!%p183_p12)
}
 0x162   :  { %s187_s30 = scalar_lea.hbm %s261_s2, 48 }
 0x163   :  { %p188_p13 = scmp.ne.s32.totalorder %s261_s2, %s187_s30  ;;  %p191_p0 = scmp.lt.u32.totalorder %s187_s30, %s261_s2 }
 0x165   :  { %p193_p1 = pnand %p191_p0, %p188_p13 }
 0x167   :  { %196 = shalt.err (!%p193_p1)
}
 0x168   :  { %131 = dma.vmem_to_hbm [thread:$0]  %s126_s25, 48, %s261_s2, [#allocation5], %s202_s20, %s202_s20, %s203_s21  }
 0x169   :  { %199 = dma.done.wait [#allocation5], 48  }
 0x16a   :  { %200 = vsyncadd [#allocation5], 4294967248 }
 0x16b   :  { %135 = vsyncpa [#allocation4], 1 }
 0x16c   :  { %136 = vsyncpa [#allocation5], 1 }

</bundles_post_ra>
